<compile_context>
chip_gen: v5e
topology: v5e:2x2
jax: 0.10.0
libtpu: 0.0.40
codegen_flags: <defaults>
</compile_context>

<pallas_src>
import functools

import numpy as np
import jax
import jax.numpy as jnp
from jax import lax
from jax.experimental import pallas as pl
from jax.experimental.pallas import tpu as pltpu

N_CLASSES = 2
DTYPE = jnp.bfloat16        # activation / weight storage dtype
VMEM_LIMIT = 64 * 1024 * 1024


# ----------------------------------------------------------------------------
# small helpers
# ----------------------------------------------------------------------------
def _pick_tile(total, target, align=1):
    """Largest divisor of `total` <= target that is a multiple of `align`;
    falls back to `total` itself (block dim == array dim is always legal)."""
    if total <= target and total % align == 0:
        return total
    for cand in range(min(target, total), 0, -1):
        if total % cand == 0 and cand % align == 0:
            return cand
    return total


def _activate(y, act):
    if act == "relu":
        return jnp.maximum(y, 0.0)
    if act == "prelu":                      # nn.PReLU() default single slope 0.25
        return jnp.where(y > 0.0, y, 0.25 * y)
    return y


def _cparams(n_axes):
    return pltpu.CompilerParams(
        dimension_semantics=("parallel",) * n_axes,
        vmem_limit_bytes=VMEM_LIMIT)


# ----------------------------------------------------------------------------
# pointwise (1x1) conv kernels: flattened rows x weight
# ----------------------------------------------------------------------------
def _pw_kernel(x_ref, w_ref, s_ref, o_ref, *, act):
    y = jnp.dot(x_ref[...], w_ref[...], preferred_element_type=jnp.float32)
    y = _activate(y + s_ref[...], act)
    o_ref[...] = y.astype(o_ref.dtype)


def pw_conv(p, x, act="none"):
    """1x1 Conv2d (+folded BN) + activation, NHWC bf16."""
    n, h, w, cin = x.shape
    coutp = p["w"].shape[-1]
    m = n * h * w
    tm = _pick_tile(m, 1024, align=8)
    out = pl.pallas_call(
        functools.partial(_pw_kernel, act=act),
        out_shape=jax.ShapeDtypeStruct((m, coutp), DTYPE),
        grid=(m // tm,),
        in_specs=[pl.BlockSpec((tm, cin), lambda i: (i, 0)),
                  pl.BlockSpec((cin, coutp), lambda i: (0, 0)),
                  pl.BlockSpec((1, coutp), lambda i: (0, 0))],
        out_specs=pl.BlockSpec((tm, coutp), lambda i: (i, 0)),
        compiler_params=_cparams(1),
    )(x.reshape(m, cin), p["w"], p["shift"])
    out = out.reshape(n, h, w, coutp)
    if p["cout"] != coutp:
        out = out[..., :p["cout"]]
    return out


def _pw_dual_kernel(x_ref, w_ref, s_ref, o1_ref, o2_ref):
    """Merged MP.conv1_1 / conv1_2: one matmul, two relu'd outputs."""
    c1 = o1_ref.shape[-1]
    y = jnp.dot(x_ref[...], w_ref[...], preferred_element_type=jnp.float32)
    y = jnp.maximum(y + s_ref[...], 0.0)
    o1_ref[...] = y[:, :c1].astype(o1_ref.dtype)
    o2_ref[...] = y[:, c1:].astype(o2_ref.dtype)


def pw_conv_dual(p, x):
    n, h, w, cin = x.shape
    c2 = p["w"].shape[-1]
    c1 = p["c1"]
    m = n * h * w
    tm = _pick_tile(m, 1024, align=8)
    o1, o2 = pl.pallas_call(
        _pw_dual_kernel,
        out_shape=(jax.ShapeDtypeStruct((m, c1), DTYPE),
                   jax.ShapeDtypeStruct((m, c2 - c1), DTYPE)),
        grid=(m // tm,),
        in_specs=[pl.BlockSpec((tm, cin), lambda i: (i, 0)),
                  pl.BlockSpec((cin, c2), lambda i: (0, 0)),
                  pl.BlockSpec((1, c2), lambda i: (0, 0))],
        out_specs=(pl.BlockSpec((tm, c1), lambda i: (i, 0)),
                   pl.BlockSpec((tm, c2 - c1), lambda i: (i, 0))),
        compiler_params=_cparams(1),
    )(x.reshape(m, cin), p["w"], p["shift"])
    return o1.reshape(n, h, w, c1), o2.reshape(n, h, w, c2 - c1)


def _pw2_kernel(xa_ref, wa_ref, xb_ref, wb_ref, s_ref, e_ref, o_ref):
    """MP.conv3 over cat([x1b, x2b]) as split-K + fused relu(x + out)."""
    acc = jnp.dot(xa_ref[...], wa_ref[...], preferred_element_type=jnp.float32)
    acc = acc + jnp.dot(xb_ref[...], wb_ref[...],
                        preferred_element_type=jnp.float32)
    y = acc + s_ref[...] + e_ref[...].astype(jnp.float32)
    o_ref[...] = jnp.maximum(y, 0.0).astype(o_ref.dtype)


def pw_conv2(p, xa, xb, extra):
    n, h, w, ca = xa.shape
    cb = xb.shape[-1]
    coutp = p["w1"].shape[-1]
    m = n * h * w
    tm = _pick_tile(m, 1024, align=8)
    out = pl.pallas_call(
        _pw2_kernel,
        out_shape=jax.ShapeDtypeStruct((m, coutp), DTYPE),
        grid=(m // tm,),
        in_specs=[pl.BlockSpec((tm, ca), lambda i: (i, 0)),
                  pl.BlockSpec((ca, coutp), lambda i: (0, 0)),
                  pl.BlockSpec((tm, cb), lambda i: (i, 0)),
                  pl.BlockSpec((cb, coutp), lambda i: (0, 0)),
                  pl.BlockSpec((1, coutp), lambda i: (0, 0)),
                  pl.BlockSpec((tm, coutp), lambda i: (i, 0))],
        out_specs=pl.BlockSpec((tm, coutp), lambda i: (i, 0)),
        compiler_params=_cparams(1),
    )(xa.reshape(m, ca), p["w1"], xb.reshape(m, cb), p["w2"], p["shift"],
      extra.reshape(m, coutp))
    return out.reshape(n, h, w, coutp)


# ----------------------------------------------------------------------------
# KxK (3x3 / 1x3 / 3x1) conv: unpadded input, in-kernel zero-pad slab assembly,
# optional fused multi-input (pre-activated) sum, VMEM f32 accumulator.
# ----------------------------------------------------------------------------
def _conv_kxk_kernel(*refs, kh, kw, ph, pw, act, pre_act):
    nx = len(refs) - 5
    x_refs = refs[:nx]
    w_ref, s_ref, o_ref, slab_ref, acc_ref = refs[nx:]
    h, w, cin = x_refs[0].shape[1], x_refs[0].shape[2], x_refs[0].shape[3]
    tr = o_ref.shape[1]
    coutp = o_ref.shape[3]
    r0 = pl.program_id(1) * tr

    # --- assemble the zero-padded (tr+2ph, w+2pw, cin) slab (fused input sum)
    slab_ref[...] = jnp.zeros_like(slab_ref)
    for dy in range(tr + 2 * ph):
        src = r0 + (dy - ph)
        valid = jnp.logical_and(src >= 0, src < h)
        src_c = jnp.clip(src, 0, h - 1)
        row = x_refs[0][0, pl.ds(src_c, 1), :, :]
        if nx > 1 or pre_act == "relu":
            row = row.astype(jnp.float32)
            for t in range(1, nx):
                row = row + x_refs[t][0, pl.ds(src_c, 1), :, :].astype(jnp.float32)
            if pre_act == "relu":
                row = jnp.maximum(row, 0.0)
        row = jnp.where(valid, row, jnp.zeros_like(row))
        slab_ref[pl.ds(dy, 1), pl.ds(pw, w), :] = row.astype(slab_ref.dtype)

    # --- conv taps: kh*kw bf16 matmuls, f32 accumulation in VMEM scratch
    acc_ref[...] = jnp.zeros_like(acc_ref)
    for dy in range(kh):
        for dx in range(kw):
            tap = slab_ref[pl.ds(dy, tr), pl.ds(dx, w), :]      # (tr, w, cin)
            acc_ref[...] += jnp.dot(tap.reshape(tr * w, cin),
                                    w_ref[dy * kw + dx],
                                    preferred_element_type=jnp.float32)
    y = _activate(acc_ref[...] + s_ref[...], act)
    o_ref[0] = y.reshape(tr, w, coutp).astype(o_ref.dtype)


def conv_kxk(p, xs, pad, act="none", pre_act="none"):
    """Stride-1 same-size KxK Conv2d (+folded BN) + activation.  `xs` may be a
    list of equally-shaped tensors that are summed (and optionally relu'd)
    in-kernel before the convolution (fuses MP's relu(a+b+c) pre-sums)."""
    if not isinstance(xs, (list, tuple)):
        xs = [xs]
    kh, kw = p["kh"], p["kw"]
    ph, pw = pad
    n, h, w, cin = xs[0].shape
    coutp = p["w"].shape[-1]
    tr_target = max(8, -(-256 // w))                 # aim for M = tr*w >= 256
    tr = _pick_tile(h, min(h, tr_target))
    nx = len(xs)
    x_spec = pl.BlockSpec((1, h, w, cin), lambda b, r: (b, 0, 0, 0))
    # TODO(synk): at production resolutions on v7x replace the whole-image
    # resident block with a carried row-halo pipeline to stay under 64 MiB VMEM.
    out = pl.pallas_call(
        functools.partial(_conv_kxk_kernel, kh=kh, kw=kw, ph=ph, pw=pw,
                          act=act, pre_act=pre_act),
        out_shape=jax.ShapeDtypeStruct((n, h, w, coutp), DTYPE),
        grid=(n, h // tr),
        in_specs=[x_spec] * nx + [
            pl.BlockSpec((kh * kw, cin, coutp), lambda b, r: (0, 0, 0)),
            pl.BlockSpec((1, coutp), lambda b, r: (0, 0))],
        out_specs=pl.BlockSpec((1, tr, w, coutp), lambda b, r: (b, r, 0, 0)),
        scratch_shapes=[pltpu.VMEM((tr + 2 * ph, w + 2 * pw, cin), DTYPE),
                        pltpu.VMEM((tr * w, coutp), jnp.float32)],
        compiler_params=_cparams(2),
    )(*xs, p["w"], p["shift"])
    if p["cout"] != coutp:
        out = out[..., :p["cout"]]
    return out


# ----------------------------------------------------------------------------
# separable resize kernels (adaptive avg pool / nearest / bilinear x2)
# ----------------------------------------------------------------------------
def _hresize_kernel(x_ref, rh_ref, o_ref):
    if x_ref.shape[1] == 1:                          # broadcast from a single row
        y = rh_ref[...].astype(jnp.float32) * x_ref[0].astype(jnp.float32)
    else:
        y = jnp.dot(rh_ref[...], x_ref[0], preferred_element_type=jnp.float32)
    o_ref[0] = y.astype(o_ref.dtype)


def _wresize_kernel(x_ref, rw_ref, o_ref):
    th = x_ref.shape[1]
    rw = rw_ref[...]
    for r in range(th):
        row = x_ref[0, r]                             # (w, c)
        if x_ref.shape[2] == 1:                       # broadcast from a single col
            y = rw.astype(jnp.float32) * row.astype(jnp.float32)
        else:
            y = jnp.dot(rw, row, preferred_element_type=jnp.float32)
        o_ref[0, r] = y.astype(o_ref.dtype)


def _height_resize(x, rh):
    n, h, w, c = x.shape
    oh = rh.shape[0]
    x2 = x.reshape(n, h, w * c)                       # free reshape, no transpose
    toh = _pick_tile(oh, 64, align=8)
    out = pl.pallas_call(
        _hresize_kernel,
        out_shape=jax.ShapeDtypeStruct((n, oh, w * c), DTYPE),
        grid=(n, oh // toh),
        in_specs=[pl.BlockSpec((1, h, w * c), lambda b, t: (b, 0, 0)),
                  pl.BlockSpec((toh, h), lambda b, t: (t, 0))],
        out_specs=pl.BlockSpec((1, toh, w * c), lambda b, t: (b, t, 0)),
        compiler_params=_cparams(2),
    )(x2, rh)
    return out.reshape(n, oh, w, c)


def _width_resize(x, rw):
    n, h, w, c = x.shape
    ow = rw.shape[0]
    th = _pick_tile(h, 8)
    return pl.pallas_call(
        _wresize_kernel,
        out_shape=jax.ShapeDtypeStruct((n, h, ow, c), DTYPE),
        grid=(n, h // th),
        in_specs=[pl.BlockSpec((1, th, w, c), lambda b, t: (b, t, 0, 0)),
                  pl.BlockSpec((ow, w), lambda b, t: (0, 0))],
        out_specs=pl.BlockSpec((1, th, ow, c), lambda b, t: (b, t, 0, 0)),
        compiler_params=_cparams(2),
    )(x, rw)


def resize(x, rh=None, rw=None):
    """Separable linear resize; identity passes (rh/rw is None) are skipped.
    TODO(synk): fuse H+W passes into one kernel (needs lane-relayout reshape)."""
    if rh is not None:
        x = _height_resize(x, rh)
    if rw is not None:
        x = _width_resize(x, rw)
    return x


# ----------------------------------------------------------------------------
# elementwise add (lane-dense 2D view)
# ----------------------------------------------------------------------------
def _addn_kernel(*refs):
    n = len(refs) - 1
    acc = refs[0][...].astype(jnp.float32)
    for i in range(1, n):
        acc = acc + refs[i][...].astype(jnp.float32)
    refs[n][...] = acc.astype(refs[n].dtype)


def addn(xs):
    shape = xs[0].shape
    n, h, w, c = shape
    rows, cols = n * h, w * c                          # lane-dense flat view
    tm = _pick_tile(rows, 256, align=8)
    spec = pl.BlockSpec((tm, cols), lambda i: (i, 0))
    out = pl.pallas_call(
        _addn_kernel,
        out_shape=jax.ShapeDtypeStruct((rows, cols), DTYPE),
        grid=(rows // tm,),
        in_specs=[spec] * len(xs),
        out_specs=spec,
        compiler_params=_cparams(1),
    )(*[x.reshape(rows, cols) for x in xs])
    return out.reshape(shape)


# ----------------------------------------------------------------------------
# fused Haar-DWT/IDWT reduction + BasicConv2d-1x1 + `*sigmoid(xy)+xy` epilogue
#   IWT(Xl+Yl, Xh) + IWT(Xl+Yl, Yh) == s + 0.25*blocksum_2x2(s),  s = x + y
# ----------------------------------------------------------------------------
def _haar_conv1_kernel(s_ref, w_ref, sh_ref, xy_ref, o_ref):
    s = s_ref[0].astype(jnp.float32)                  # (th, w, c), th & w even
    rs = s + jnp.roll(s, -1, axis=0)                  # row-pair sums at even rows
    ri = lax.broadcasted_iota(jnp.int32, s.shape, 0)
    rs = jnp.where(ri % 2 == 0, rs, jnp.roll(rs, 1, axis=0))
    cs = rs + jnp.roll(rs, -1, axis=1)                # + column neighbour
    ci = lax.broadcasted_iota(jnp.int32, s.shape, 1)
    cs = jnp.where(ci % 2 == 0, cs, jnp.roll(cs, 1, axis=1))
    hs = (s + 0.25 * cs).astype(DTYPE)                # fused xy_m, (th, w, c)
    th, w, c = hs.shape
    y = jnp.dot(hs.reshape(th * w, c), w_ref[...],
                preferred_element_type=jnp.float32) + sh_ref[...]
    y = jnp.maximum(y, 0.0)                           # BasicConv2d ReLU
    coutp = o_ref.shape[3]
    e = xy_ref[0].reshape(th * w, coutp).astype(jnp.float32)
    y = y * (1.0 / (1.0 + jnp.exp(-e))) + e           # conv1(xy_m)*sigmoid(xy)+xy
    o_ref[0] = y.reshape(th, w, coutp).astype(o_ref.dtype)


def dwt_conv1_fused(p, s, xy):
    n, h, w, c = s.shape
    assert h % 2 == 0 and w % 2 == 0, "Haar DWT requires even spatial dims"
    coutp = p["w"].shape[-1]
    th = _pick_tile(h, 16, align=2)
    assert th % 2 == 0
    out = pl.pallas_call(
        _haar_conv1_kernel,
        out_shape=jax.ShapeDtypeStruct((n, h, w, coutp), DTYPE),
        grid=(n, h // th),
        in_specs=[pl.BlockSpec((1, th, w, c), lambda b, t: (b, t, 0, 0)),
                  pl.BlockSpec((c, coutp), lambda b, t: (0, 0)),
                  pl.BlockSpec((1, coutp), lambda b, t: (0, 0)),
                  pl.BlockSpec((1, th, w, coutp), lambda b, t: (b, t, 0, 0))],
        out_specs=pl.BlockSpec((1, th, w, coutp), lambda b, t: (b, t, 0, 0)),
        compiler_params=_cparams(2),
    )(s, p["w"], p["shift"], xy)
    if p["cout"] != coutp:
        out = out[..., :p["cout"]]
    return out


# ----------------------------------------------------------------------------
# resize matrices (numpy glue, exact PyTorch semantics)
# ----------------------------------------------------------------------------
@functools.lru_cache(maxsize=None)
def adaptive_avg_matrix(in_size, out_size):
    m = np.zeros((out_size, in_size), np.float32)
    for o in range(out_size):
        s = (o * in_size) // out_size
        e = ((o + 1) * in_size + out_size - 1) // out_size
        m[o, s:e] = 1.0 / (e - s)
    return jnp.asarray(m, dtype=DTYPE)


@functools.lru_cache(maxsize=None)
def nearest_matrix(in_size, out_size):
    m = np.zeros((out_size, in_size), np.float32)
    for o in range(out_size):
        m[o, min(in_size - 1, (o * in_size) // out_size)] = 1.0
    return jnp.asarray(m, dtype=DTYPE)


@functools.lru_cache(maxsize=None)
def bilinear_up2_matrix(in_size):
    out_size = 2 * in_size
    m = np.zeros((out_size, in_size), np.float32)
    for o in range(out_size):
        src = max((o + 0.5) * 0.5 - 0.5, 0.0)         # align_corners=False
        i0 = min(int(np.floor(src)), in_size - 1)
        i1 = min(i0 + 1, in_size - 1)
        f = src - i0
        m[o, i0] += 1.0 - f
        m[o, i1] += f
    return jnp.asarray(m, dtype=DTYPE)


# ----------------------------------------------------------------------------
# module forwards
# ----------------------------------------------------------------------------
def mp_forward(p, x):
    n, h, w, c = x.shape
    s0, s1 = p["pool_hw"]
    x1, x2 = pw_conv_dual(p["conv1"], x)              # merged conv1_1 / conv1_2
    x2_1 = conv_kxk(p["conv2_0"], x1, (1, 1), "none")
    p1 = resize(x1, adaptive_avg_matrix(h, s0), adaptive_avg_matrix(w, s0))
    x2_2 = resize(conv_kxk(p["conv2_1"], p1, (1, 1), "none"),
                  nearest_matrix(s0, h), nearest_matrix(s0, w))
    p2 = resize(x1, adaptive_avg_matrix(h, s1), adaptive_avg_matrix(w, s1))
    x2_3 = resize(conv_kxk(p["conv2_2"], p2, (1, 1), "none"),
                  nearest_matrix(s1, h), nearest_matrix(s1, w))
    p3 = resize(x2, adaptive_avg_matrix(h, 1), None)          # AdaptiveAvgPool2d((1,None))
    x2_4 = resize(conv_kxk(p["conv2_3"], p3, (0, 1), "none"),
                  nearest_matrix(1, h), None)
    p4 = resize(x2, None, adaptive_avg_matrix(w, 1))          # AdaptiveAvgPool2d((None,1))
    x2_5 = resize(conv_kxk(p["conv2_4"], p4, (1, 0), "none"),
                  None, nearest_matrix(1, w))
    # relu(sum) pre-activation fused into the conv2_5/conv2_6 kernels
    x1b = conv_kxk(p["conv2_5"], [x2_1, x2_2, x2_3], (1, 1), "relu", pre_act="relu")
    x2b = conv_kxk(p["conv2_6"], [x2_5, x2_4], (1, 1), "relu", pre_act="relu")
    # conv3 over cat([x1b, x2b]) as split-K + fused relu(x + out)
    return pw_conv2(p["conv3"], x1b, x2b, extra=x)


def dwt_block_forward(p, x, y):
    s = addn([x, y])                                  # x + y (shared by MP and DWT)
    xy = mp_forward(p["MP"], s)
    # Haar DWT/IDWT reduction + conv1 + (*sigmoid(xy) + xy) fused in one kernel
    return dwt_conv1_fused(p["conv1"], s, xy)


def pp_upsample_forward(p, x):
    _, h, w, _ = x.shape
    up = resize(x, bilinear_up2_matrix(h), bilinear_up2_matrix(w))
    return conv_kxk(p, up, (1, 1), "prelu")


def up2_forward(x):
    _, h, w, _ = x.shape
    return resize(x, bilinear_up2_matrix(h), bilinear_up2_matrix(w))


def salhead_forward(p, x):
    # Dropout2d(p=0.1) is identity in eval mode.
    return pw_conv(p, x, act="none")


def _patchify(x, s):
    n, h, w, c = x.shape
    x = x.reshape(n, h // s, s, w // s, s, c)
    x = jnp.transpose(x, (0, 1, 3, 2, 4, 5))
    return x.reshape(n, h // s, w // s, s * s * c)


def backbone_forward(p, x):
    # TODO(synk): the mit_b4 transformer backbone is not in the provided source;
    # a deterministic patch-embedding pyramid with identical output shapes
    # (C = 64/128/320/512 at strides /4,/8,/16,/32) is substituted.
    return [pw_conv(p[f"proj{i + 1}"], _patchify(x, s), act="relu")
            for i, s in enumerate((4, 8, 16, 32))]


# ----------------------------------------------------------------------------
# deterministic parameter initialization (BN folded, bf16 weights)
# ----------------------------------------------------------------------------
def _key_stream():
    key = jax.random.PRNGKey(42)
    while True:
        key, sub = jax.random.split(key)
        yield sub


_KEYS = _key_stream()


def init_conv(cin, cout, kh=1, kw=1, with_bn=True, bias=False, lane_pad=False):
    w = 0.1 * jax.random.normal(next(_KEYS), (kh, kw, cin, cout), jnp.float32)
    if with_bn:     # inference BatchNorm folded into per-channel scale/shift
        scale = 1.0 + 0.1 * jax.random.normal(next(_KEYS), (cout,), jnp.float32)
        shift = 0.05 * jax.random.normal(next(_KEYS), (cout,), jnp.float32)
    else:
        scale = jnp.ones((cout,), jnp.float32)
        shift = (0.05 * jax.random.normal(next(_KEYS), (cout,), jnp.float32)
                 if bias else jnp.zeros((cout,), jnp.float32))
    # TODO(synk): with real pretrained weights the shift must be
    #             beta - running_mean * gamma / sqrt(running_var + eps).
    w = w * scale                                           # fold BN scale into W
    coutp = cout
    if lane_pad and cout % 8 != 0:                          # pad heads only to 8 lanes
        coutp = ((cout + 7) // 8) * 8
        w = jnp.pad(w, ((0, 0), (0, 0), (0, 0), (0, coutp - cout)))
        shift = jnp.pad(shift, (0, coutp - cout))
    p = {"shift": shift.reshape(1, coutp), "cout": cout, "kh": kh, "kw": kw}
    if kh == 1 and kw == 1:
        p["w"] = w.reshape(cin, coutp).astype(DTYPE)
    else:
        p["w"] = w.reshape(kh * kw, cin, coutp).astype(DTYPE)
    return p


def init_mp(channels, pool_hw):
    inter = channels // 4
    conv1 = init_conv(channels, 2 * inter)                  # merged conv1_1+conv1_2
    conv1["c1"] = inter
    p = {
        "pool_hw": pool_hw,
        "conv1": conv1,
        "conv2_0": init_conv(inter, inter, 3, 3),
        "conv2_1": init_conv(inter, inter, 3, 3),
        "conv2_2": init_conv(inter, inter, 3, 3),
        "conv2_3": init_conv(inter, inter, 1, 3),
        "conv2_4": init_conv(inter, inter, 3, 1),
        "conv2_5": init_conv(inter, inter, 3, 3),
        "conv2_6": init_conv(inter, inter, 3, 3),
    }
    c3 = init_conv(2 * inter, channels)                     # conv3: split-K halves
    w = c3.pop("w")
    c3["w1"], c3["w2"] = w[:inter], w[inter:]
    p["conv3"] = c3
    return p


def init_params(n_classes):
    p = {}
    for name in ("backboner", "backboned"):
        p[name] = {
            "proj1": init_conv(4 * 4 * 3, 64),
            "proj2": init_conv(8 * 8 * 3, 128),
            "proj3": init_conv(16 * 16 * 3, 320),
            "proj4": init_conv(32 * 32 * 3, 512),
        }
    p["dscon512"] = init_conv(512, 320)
    p["up_conv512_320"] = init_conv(512, 320, 3, 3)
    p["up_conv320_128"] = init_conv(320, 128, 3, 3)
    p["up_conv128_64"] = init_conv(128, 64, 3, 3)
    p["up_conv64_nclass"] = init_conv(64, n_classes, 3, 3, lane_pad=True)
    p["dwt320"] = {"MP": init_mp(320, (30, 40)), "conv1": init_conv(320, 320)}
    p["dwt128"] = {"MP": init_mp(128, (60, 80)), "conv1": init_conv(128, 128)}
    p["dwt64"] = {"MP": init_mp(64, (120, 160)), "conv1": init_conv(64, 64)}
    p["f4_p"] = init_conv(320, n_classes, with_bn=False, bias=True, lane_pad=True)
    p["f3_p"] = init_conv(128, n_classes, with_bn=False, bias=True, lane_pad=True)
    p["f2_p"] = init_conv(64, n_classes, with_bn=False, bias=True, lane_pad=True)
    return p


# ----------------------------------------------------------------------------
# EnDecoderModel forward
# ----------------------------------------------------------------------------
def endecoder_forward(params, rgb, dep):
    to_nhwc = lambda t: jnp.transpose(t, (0, 2, 3, 1)).astype(DTYPE)
    to_nchw = lambda t: jnp.transpose(t, (0, 3, 1, 2)).astype(jnp.float32)
    rgb = to_nhwc(rgb)
    dep = to_nhwc(dep)

    rf1, rf2, rf3, rf4 = backbone_forward(params["backboner"], rgb)
    df1, df2, df3, df4 = backbone_forward(params["backboned"], dep)

    fd_pervise, cluster = [], []
    # TODO(synk): MAc fusion module is not provided in the source; elementwise sum used.
    fd1 = addn([rf1, df1])
    fd2 = addn([rf2, df2])
    # TODO(synk): SCDC module is not provided in the source; treated as identity.
    cluster.append(rf3)
    fd3 = addn([rf3, df3])
    rf4_align = pw_conv(params["dscon512"], rf4, act="relu")
    cluster.append(rf4_align)
    fd4 = addn([rf4, df4])

    fd4_up = pp_upsample_forward(params["up_conv512_320"], fd4)
    fd34 = dwt_block_forward(params["dwt320"], fd3, fd4_up)
    fd_pervise.append(salhead_forward(params["f4_p"], fd34))

    fd34_up = pp_upsample_forward(params["up_conv320_128"], fd34)
    fd234 = dwt_block_forward(params["dwt128"], fd2, fd34_up)
    fd_pervise.append(salhead_forward(params["f3_p"], fd234))

    fd234_up = pp_upsample_forward(params["up_conv128_64"], fd234)
    fd1234 = dwt_block_forward(params["dwt64"], fd1, fd234_up)
    fd_pervise.append(salhead_forward(params["f2_p"], fd1234))

    out = up2_forward(fd1234)
    out_final = pp_upsample_forward(params["up_conv64_nclass"], out)

    return (to_nchw(out_final),
            [to_nchw(t) for t in fd_pervise],
            [to_nchw(t) for t in cluster])


# ----------------------------------------------------------------------------
if __name__ == "__main__":
    params = init_params(N_CLASSES)

    key = jax.random.PRNGKey(0)
    k1, k2 = jax.random.split(key)
    rgb = jax.random.normal(k1, (2, 3, 64, 64), jnp.float32)   # NCHW like PyTorch
    dep = jax.random.normal(k2, (2, 3, 64, 64), jnp.float32)

    out_final, fd_pervise, cluster = endecoder_forward(params, rgb, dep)
    jax.block_until_ready(out_final)
    for t in fd_pervise + cluster:
        jax.block_until_ready(t)

    assert out_final.shape == (2, N_CLASSES, 64, 64)
    assert [t.shape for t in fd_pervise] == [(2, N_CLASSES, 4, 4),
                                             (2, N_CLASSES, 8, 8),
                                             (2, N_CLASSES, 16, 16)]
    assert [t.shape for t in cluster] == [(2, 320, 4, 4), (2, 320, 2, 2)]
    print("KERNEL_OK")
</pallas_src>

<mosaic_0001>
module attributes {stable_mosaic.version = 11 : i64} {
  func.func @_pw_kernel(%arg0: i32, %arg1: memref<512x48xbf16, #tpu.memory_space<vmem>>, %arg2: memref<48x64xbf16, #tpu.memory_space<vmem>>, %arg3: memref<1x64xf32, #tpu.memory_space<vmem>>, %arg4: memref<512x64xbf16, #tpu.memory_space<vmem>>) attributes {dimension_semantics = [#tpu.dimension_semantics<parallel>], iteration_bounds = array<i64: 1>, scalar_prefetch = 0 : i64, scratch_operands = 0 : i64, tpu.core_type = #tpu.core_type<tc>, window_params = [{transform_indices = @transform_0, window_bounds = array<i64: 512, 48>}, {pipeline_mode = #tpu.pipeline_mode<synchronous>, transform_indices = @transform_1, window_bounds = array<i64: 48, 64>}, {pipeline_mode = #tpu.pipeline_mode<synchronous>, transform_indices = @transform_2, window_bounds = array<i64: 1, 64>}, {transform_indices = @transform_3, window_bounds = array<i64: 512, 64>}]} {
    %c0 = arith.constant 0 : index
    %c0_0 = arith.constant 0 : index
    %0 = vector.load %arg1[%c0, %c0_0] : memref<512x48xbf16, #tpu.memory_space<vmem>>, vector<512x48xbf16>
    %c0_1 = arith.constant 0 : index
    %c0_2 = arith.constant 0 : index
    %1 = vector.load %arg2[%c0_1, %c0_2] : memref<48x64xbf16, #tpu.memory_space<vmem>>, vector<48x64xbf16>
    %cst = arith.constant dense<0.000000e+00> : vector<512x64xf32>
    %2 = tpu.matmul %0, %1, %cst {dimension_numbers = #tpu.dot_dimension_numbers<[1], [0], [0], [1], [0, 0, 1, 1], [], []>} : vector<512x48xbf16>, vector<48x64xbf16>, vector<512x64xf32> -> vector<512x64xf32>
    %c0_3 = arith.constant 0 : index
    %c0_4 = arith.constant 0 : index
    %3 = vector.load %arg3[%c0_3, %c0_4] : memref<1x64xf32, #tpu.memory_space<vmem>>, vector<1x64xf32>
    %4 = vector.broadcast %3 : vector<1x64xf32> to vector<512x64xf32>
    %5 = arith.addf %2, %4 : vector<512x64xf32>
    %cst_5 = arith.constant 0.000000e+00 : f32
    %6 = vector.broadcast %cst_5 : f32 to vector<512x64xf32>
    %7 = arith.maximumf %5, %6 : vector<512x64xf32>
    %8 = arith.truncf %7 : vector<512x64xf32> to vector<512x64xbf16>
    %c0_6 = arith.constant 0 : index
    %c0_7 = arith.constant 0 : index
    %9 = vector.load %arg4[%c0_6, %c0_7] : memref<512x64xbf16, #tpu.memory_space<vmem>>, vector<512x64xbf16>
    tpu.vector_store %arg4[%c0_6, %c0_7], %8 {strides = array<i32>} : memref<512x64xbf16, #tpu.memory_space<vmem>>, vector<512x64xbf16>,
    return
  }
  func.func @transform_0(%arg0: i32) -> (i32, i32) {
    %c0_i32 = arith.constant 0 : i32
    %c0_i32_0 = arith.constant 0 : i32
    return %arg0, %c0_i32 : i32, i32
  }
  func.func @transform_1(%arg0: i32) -> (i32, i32) {
    %c0_i32 = arith.constant 0 : i32
    %c0_i32_0 = arith.constant 0 : i32
    %c0_i32_1 = arith.constant 0 : i32
    return %c0_i32, %c0_i32_0 : i32, i32
  }
  func.func @transform_2(%arg0: i32) -> (i32, i32) {
    %c0_i32 = arith.constant 0 : i32
    %c0_i32_0 = arith.constant 0 : i32
    %c0_i32_1 = arith.constant 0 : i32
    return %c0_i32, %c0_i32_0 : i32, i32
  }
  func.func @transform_3(%arg0: i32) -> (i32, i32) {
    %c0_i32 = arith.constant 0 : i32
    %c0_i32_0 = arith.constant 0 : i32
    return %arg0, %c0_i32 : i32, i32
  }
}

</mosaic_0001>

<bundles_post_ra>
// kernel: tpu_custom_call.1
= control target key start
LH: loop header
LB: loop body
LE: loop exit
PB: predicated region body
PF: predicated region fallthrough
CT: control target
= control target key end

     0   :  { %vm267_vm0 = vcmask 392192   ;;  %vm661_vm1 = vcmask 519168   ;;  %s1429_s1 = inlined_call_operand.vmem [shape: bf16[48,64], index: 1, kind: input, shape index: {}]   ;;  %s1430_s2 = inlined_call_operand.vmem [shape: f32[1,64], index: 2, kind: input, shape index: {}]   ;;  %s1431_s0 = inlined_call_operand.vmem [shape: bf16[512,48], index: 0, kind: input, shape index: {}]   ;;  %s1432_s3 = inlined_call_operand.vmem [shape: bf16[512,64], index: 3, kind: output, shape index: {}]  }
   0x1   :  { %v936_v0 = vld [vmem:[%s1429_s1 + $0x10] sm:$0xff]  ;;  %v935_v1 = vld [vmem:[%s1429_s1 + $0x8] sm:$0xff]  ;;  %v934_v2 = vld [vmem:[%s1429_s1] sm:$0xff] }
   0x2   :  { %369 = vmatpush.bf16.msra.mxu0 %v936_v0  ;;  %937 = vmatpush.bf16.msra.mxu1 %v936_v0  ;;  %v902_v3 = vld [vmem:[%s1431_s0] sm:$0xff]  ;;  %v903_v7 = vld [vmem:[%s1431_s0 + $0x8] sm:$0xff]  ;;  %v904_v11 = vld [vmem:[%s1431_s0 + $0x10] sm:$0xff] }
   0x3   :  { %938 = vmatpush.bf16.msra.mxu2 %v936_v0  ;;  %939 = vmatpush.bf16.msra.mxu3 %v936_v0  ;;  %v910_v4 = vld [vmem:[%s1431_s0 + $0x40] sm:$0xff]  ;;  %v911_v8 = vld [vmem:[%s1431_s0 + $0x48] sm:$0xff]  ;;  %v912_v12 = vld [vmem:[%s1431_s0 + $0x50] sm:$0xff] }
   0x4   :  { %v918_v5 = vld [vmem:[%s1431_s0 + $0x80] sm:$0xff]  ;;  %v919_v9 = vld [vmem:[%s1431_s0 + $0x88] sm:$0xff]  ;;  %v920_v13 = vld [vmem:[%s1431_s0 + $0x90] sm:$0xff] }
   0x5   :  { %v926_v6 = vld [vmem:[%s1431_s0 + $0xc0] sm:$0xff]  ;;  %v927_v10 = vld [vmem:[%s1431_s0 + $0xc8] sm:$0xff]  ;;  %v928_v14 = vld [vmem:[%s1431_s0 + $0xd0] sm:$0xff] }
   0x6   :  { %370 = vmatpush.bf16.msra.mxu0 %v935_v1  ;;  %940 = vmatpush.bf16.msra.mxu1 %v935_v1  ;;  %v905_v15 = vld [vmem:[%s1431_s0 + $0x18] sm:$0xff]  ;;  %v906_v19 = vld [vmem:[%s1431_s0 + $0x20] sm:$0xff]  ;;  %v907_v23 = vld [vmem:[%s1431_s0 + $0x28] sm:$0xff] }
   0x7   :  { %941 = vmatpush.bf16.msra.mxu2 %v935_v1  ;;  %942 = vmatpush.bf16.msra.mxu3 %v935_v1  ;;  %v913_v16 = vld [vmem:[%s1431_s0 + $0x58] sm:$0xff]  ;;  %v914_v20 = vld [vmem:[%s1431_s0 + $0x60] sm:$0xff]  ;;  %v915_v24 = vld [vmem:[%s1431_s0 + $0x68] sm:$0xff] }
   0x8   :  { %v921_v17 = vld [vmem:[%s1431_s0 + $0x98] sm:$0xff]  ;;  %v922_v21 = vld [vmem:[%s1431_s0 + $0xa0] sm:$0xff]  ;;  %v923_v25 = vld [vmem:[%s1431_s0 + $0xa8] sm:$0xff] }
   0x9   :  { %v929_v18 = vld [vmem:[%s1431_s0 + $0xd8] sm:$0xff]  ;;  %v930_v22 = vld [vmem:[%s1431_s0 + $0xe0] sm:$0xff]  ;;  %v931_v26 = vld [vmem:[%s1431_s0 + $0xe8] sm:$0xff] }
   0xa   :  { %371 = vmatpush.bf16.msra.mxu0 %v934_v2  ;;  %943 = vmatpush.bf16.msra.mxu1 %v934_v2  ;;  %v908_v27 = vld [vmem:[%s1431_s0 + $0x30] sm:$0xff]  ;;  %v909_v31 = vld [vmem:[%s1431_s0 + $0x38] sm:$0xff]  ;;  %v1107_v35 = vld [vmem:[%s1430_s2] ss:$0 sm:$0xff] }
   0xb   :  { %944 = vmatpush.bf16.msra.mxu2 %v934_v2  ;;  %945 = vmatpush.bf16.msra.mxu3 %v934_v2  ;;  %v916_v28 = vld [vmem:[%s1431_s0 + $0x70] sm:$0xff]  ;;  %v917_v32 = vld [vmem:[%s1431_s0 + $0x78] sm:$0xff] }
   0xc   :  { %v924_v29 = vld [vmem:[%s1431_s0 + $0xb0] sm:$0xff]  ;;  %v925_v33 = vld [vmem:[%s1431_s0 + $0xb8] sm:$0xff] }
   0xd   :  { %870 = vmatmul.msk.bf16.vlgmr.msra.gmra.mxu0 %vm267_vm0, %v902_v3  ;;  %878 = vmatmul.msk.bf16.vlgmr.msra.gmra.mxu1 %vm267_vm0, %v910_v4  ;;  %v932_v30 = vld [vmem:[%s1431_s0 + $0xf0] sm:$0xff]  ;;  %v933_v34 = vld [vmem:[%s1431_s0 + $0xf8] sm:$0xff] }
   0xe   :  { %886 = vmatmul.msk.bf16.vlgmr.msra.gmra.mxu2 %vm267_vm0, %v918_v5  ;;  %894 = vmatmul.msk.bf16.vlgmr.msra.gmra.mxu3 %vm267_vm0, %v926_v6 }
  0x1d   :  { %871 = vmatmul.msk.bf16.gmra.mxu0 %vm267_vm0, %v903_v7  ;;  %879 = vmatmul.msk.bf16.gmra.mxu1 %vm267_vm0, %v911_v8 }
  0x1e   :  { %887 = vmatmul.msk.bf16.gmra.mxu2 %vm267_vm0, %v919_v9  ;;  %895 = vmatmul.msk.bf16.gmra.mxu3 %vm267_vm0, %v927_v10 }
  0x2d   :  { %872 = vmatmul.msk.bf16.gmra.mxu0 %vm267_vm0, %v904_v11  ;;  %880 = vmatmul.msk.bf16.gmra.mxu1 %vm267_vm0, %v912_v12 }
  0x2e   :  { %888 = vmatmul.msk.bf16.gmra.mxu2 %vm267_vm0, %v920_v13  ;;  %896 = vmatmul.msk.bf16.gmra.mxu3 %vm267_vm0, %v928_v14 }
  0x3d   :  { %873 = vmatmul.msk.bf16.gmra.mxu0 %vm267_vm0, %v905_v15  ;;  %881 = vmatmul.msk.bf16.gmra.mxu1 %vm267_vm0, %v913_v16 }
  0x3e   :  { %889 = vmatmul.msk.bf16.gmra.mxu2 %vm267_vm0, %v921_v17  ;;  %897 = vmatmul.msk.bf16.gmra.mxu3 %vm267_vm0, %v929_v18 }
  0x4d   :  { %874 = vmatmul.msk.bf16.gmra.mxu0 %vm267_vm0, %v906_v19  ;;  %882 = vmatmul.msk.bf16.gmra.mxu1 %vm267_vm0, %v914_v20 }
  0x4e   :  { %890 = vmatmul.msk.bf16.gmra.mxu2 %vm267_vm0, %v922_v21  ;;  %898 = vmatmul.msk.bf16.gmra.mxu3 %vm267_vm0, %v930_v22 }
  0x5d   :  { %875 = vmatmul.msk.bf16.gmra.mxu0 %vm267_vm0, %v907_v23  ;;  %883 = vmatmul.msk.bf16.gmra.mxu1 %vm267_vm0, %v915_v24 }
  0x5e   :  { %891 = vmatmul.msk.bf16.gmra.mxu2 %vm267_vm0, %v923_v25  ;;  %899 = vmatmul.msk.bf16.gmra.mxu3 %vm267_vm0, %v931_v26 }
  0x6d   :  { %876 = vmatmul.msk.bf16.gmra.mxu0 %vm267_vm0, %v908_v27  ;;  %884 = vmatmul.msk.bf16.gmra.mxu1 %vm267_vm0, %v916_v28 }
  0x6e   :  { %892 = vmatmul.msk.bf16.gmra.mxu2 %vm267_vm0, %v924_v29  ;;  %900 = vmatmul.msk.bf16.gmra.mxu3 %vm267_vm0, %v932_v30 }
  0x7d   :  { %877 = vmatmul.msk.bf16.gmra.mxu0 %vm267_vm0, %v909_v31  ;;  %885 = vmatmul.msk.bf16.gmra.mxu1 %vm267_vm0, %v917_v32 }
  0x7e   :  { %893 = vmatmul.msk.bf16.gmra.mxu2 %vm267_vm0, %v925_v33  ;;  %901 = vmatmul.msk.bf16.gmra.mxu3 %vm267_vm0, %v933_v34 }
  0x8a   :  { %v373_v36 = vpop.f32.mrf.mxu0  ;;  %v413_v37 = vpop.f32.mrf.mxu1 }
  0x8b   :  { %v374_v38 = vadd.f32 %v1107_v35, %v373_v36  ;;  %v414_v39 = vadd.f32 %v1107_v35, %v413_v37 }
  0x8d   :  { %v533_v40 = vmax.f32 %v374_v38, 0.0  ;;  %v549_v41 = vmax.f32 %v414_v39, 0.0 }
  0x8f   :  { %v597_v42 = vpack.c.bf16 %v533_v40, %v533_v40  ;;  %v613_v43 = vpack.c.bf16 %v549_v41, %v549_v41 }
  0x91   :  { %662 = vst.msk [vmem:[%s1432_s3] sm:$0xf] %vm661_vm1, %v597_v42  ;;  %v453_v44 = vpop.f32.mrf.mxu2  ;;  %v493_v45 = vpop.f32.mrf.mxu3 }
  0x92   :  { %678 = vst.msk [vmem:[%s1432_s3 + $0x40] sm:$0xf] %vm661_vm1, %v613_v43  ;;  %v454_v46 = vadd.f32 %v1107_v35, %v453_v44  ;;  %v494_v47 = vadd.f32 %v1107_v35, %v493_v45  ;;  %v375_v48 = vpop.f32.mrf.mxu0  ;;  %v415_v49 = vpop.f32.mrf.mxu1 }
  0x93   :  { %v376_v50 = vadd.f32 %v1107_v35, %v375_v48  ;;  %v416_v51 = vadd.f32 %v1107_v35, %v415_v49 }
  0x94   :  { %v565_v52 = vmax.f32 %v454_v46, 0.0  ;;  %v581_v53 = vmax.f32 %v494_v47, 0.0 }
  0x95   :  { %v534_v54 = vmax.f32 %v376_v50, 0.0  ;;  %v550_v55 = vmax.f32 %v416_v51, 0.0 }
  0x96   :  { %v629_v56 = vpack.c.bf16 %v565_v52, %v565_v52  ;;  %v645_v57 = vpack.c.bf16 %v581_v53, %v581_v53 }
  0x97   :  { %v598_v58 = vpack.c.bf16 %v534_v54, %v534_v54  ;;  %v614_v59 = vpack.c.bf16 %v550_v55, %v550_v55 }
  0x98   :  { %694 = vst.msk [vmem:[%s1432_s3 + $0x80] sm:$0xf] %vm661_vm1, %v629_v56 }
  0x99   :  { %710 = vst.msk [vmem:[%s1432_s3 + $0xc0] sm:$0xf] %vm661_vm1, %v645_v57  ;;  %v455_v60 = vpop.f32.mrf.mxu2  ;;  %v495_v61 = vpop.f32.mrf.mxu3 }
  0x9a   :  { %663 = vst.msk [vmem:[%s1432_s3 + $0x4] sm:$0xf] %vm661_vm1, %v598_v58  ;;  %v456_v62 = vadd.f32 %v1107_v35, %v455_v60  ;;  %v496_v63 = vadd.f32 %v1107_v35, %v495_v61  ;;  %v378_v0 = vpop.f32.mrf.mxu0  ;;  %v418_v1 = vpop.f32.mrf.mxu1 }
  0x9b   :  { %679 = vst.msk [vmem:[%s1432_s3 + $0x44] sm:$0xf] %vm661_vm1, %v614_v59  ;;  %v379_v2 = vadd.f32 %v1107_v35, %v378_v0  ;;  %v419_v3 = vadd.f32 %v1107_v35, %v418_v1 }
  0x9c   :  { %v566_v4 = vmax.f32 %v456_v62, 0.0  ;;  %v582_v5 = vmax.f32 %v496_v63, 0.0 }
  0x9d   :  { %v535_v6 = vmax.f32 %v379_v2, 0.0  ;;  %v551_v7 = vmax.f32 %v419_v3, 0.0 }
  0x9e   :  { %v630_v8 = vpack.c.bf16 %v566_v4, %v566_v4  ;;  %v646_v9 = vpack.c.bf16 %v582_v5, %v582_v5 }
  0x9f   :  { %v599_v10 = vpack.c.bf16 %v535_v6, %v535_v6  ;;  %v615_v11 = vpack.c.bf16 %v551_v7, %v551_v7 }
  0xa0   :  { %695 = vst.msk [vmem:[%s1432_s3 + $0x84] sm:$0xf] %vm661_vm1, %v630_v8 }
  0xa1   :  { %711 = vst.msk [vmem:[%s1432_s3 + $0xc4] sm:$0xf] %vm661_vm1, %v646_v9  ;;  %v458_v12 = vpop.f32.mrf.mxu2  ;;  %v498_v13 = vpop.f32.mrf.mxu3 }
  0xa2   :  { %664 = vst.msk [vmem:[%s1432_s3 + $0x8] sm:$0xf] %vm661_vm1, %v599_v10  ;;  %v459_v14 = vadd.f32 %v1107_v35, %v458_v12  ;;  %v499_v15 = vadd.f32 %v1107_v35, %v498_v13  ;;  %v380_v16 = vpop.f32.mrf.mxu0  ;;  %v420_v17 = vpop.f32.mrf.mxu1 }
  0xa3   :  { %680 = vst.msk [vmem:[%s1432_s3 + $0x48] sm:$0xf] %vm661_vm1, %v615_v11  ;;  %v381_v18 = vadd.f32 %v1107_v35, %v380_v16  ;;  %v421_v19 = vadd.f32 %v1107_v35, %v420_v17 }
  0xa4   :  { %v567_v20 = vmax.f32 %v459_v14, 0.0  ;;  %v583_v21 = vmax.f32 %v499_v15, 0.0 }
  0xa5   :  { %v536_v22 = vmax.f32 %v381_v18, 0.0  ;;  %v552_v23 = vmax.f32 %v421_v19, 0.0 }
  0xa6   :  { %v631_v24 = vpack.c.bf16 %v567_v20, %v567_v20  ;;  %v647_v25 = vpack.c.bf16 %v583_v21, %v583_v21 }
  0xa7   :  { %v600_v26 = vpack.c.bf16 %v536_v22, %v536_v22  ;;  %v616_v27 = vpack.c.bf16 %v552_v23, %v552_v23 }
  0xa8   :  { %696 = vst.msk [vmem:[%s1432_s3 + $0x88] sm:$0xf] %vm661_vm1, %v631_v24 }
  0xa9   :  { %712 = vst.msk [vmem:[%s1432_s3 + $0xc8] sm:$0xf] %vm661_vm1, %v647_v25  ;;  %v460_v28 = vpop.f32.mrf.mxu2  ;;  %v500_v29 = vpop.f32.mrf.mxu3 }
  0xaa   :  { %665 = vst.msk [vmem:[%s1432_s3 + $0xc] sm:$0xf] %vm661_vm1, %v600_v26  ;;  %v461_v30 = vadd.f32 %v1107_v35, %v460_v28  ;;  %v501_v31 = vadd.f32 %v1107_v35, %v500_v29  ;;  %v383_v32 = vpop.f32.mrf.mxu0  ;;  %v423_v33 = vpop.f32.mrf.mxu1 }
  0xab   :  { %681 = vst.msk [vmem:[%s1432_s3 + $0x4c] sm:$0xf] %vm661_vm1, %v616_v27  ;;  %v384_v34 = vadd.f32 %v1107_v35, %v383_v32  ;;  %v424_v36 = vadd.f32 %v1107_v35, %v423_v33 }
  0xac   :  { %v568_v37 = vmax.f32 %v461_v30, 0.0  ;;  %v584_v38 = vmax.f32 %v501_v31, 0.0 }
  0xad   :  { %v537_v39 = vmax.f32 %v384_v34, 0.0  ;;  %v553_v40 = vmax.f32 %v424_v36, 0.0 }
  0xae   :  { %v632_v41 = vpack.c.bf16 %v568_v37, %v568_v37  ;;  %v648_v42 = vpack.c.bf16 %v584_v38, %v584_v38 }
  0xaf   :  { %v601_v43 = vpack.c.bf16 %v537_v39, %v537_v39  ;;  %v617_v44 = vpack.c.bf16 %v553_v40, %v553_v40 }
  0xb0   :  { %697 = vst.msk [vmem:[%s1432_s3 + $0x8c] sm:$0xf] %vm661_vm1, %v632_v41 }
  0xb1   :  { %713 = vst.msk [vmem:[%s1432_s3 + $0xcc] sm:$0xf] %vm661_vm1, %v648_v42  ;;  %v463_v45 = vpop.f32.mrf.mxu2  ;;  %v503_v46 = vpop.f32.mrf.mxu3 }
  0xb2   :  { %666 = vst.msk [vmem:[%s1432_s3 + $0x10] sm:$0xf] %vm661_vm1, %v601_v43  ;;  %v464_v47 = vadd.f32 %v1107_v35, %v463_v45  ;;  %v504_v48 = vadd.f32 %v1107_v35, %v503_v46  ;;  %v385_v49 = vpop.f32.mrf.mxu0  ;;  %v425_v50 = vpop.f32.mrf.mxu1 }
  0xb3   :  { %682 = vst.msk [vmem:[%s1432_s3 + $0x50] sm:$0xf] %vm661_vm1, %v617_v44  ;;  %v386_v51 = vadd.f32 %v1107_v35, %v385_v49  ;;  %v426_v52 = vadd.f32 %v1107_v35, %v425_v50 }
  0xb4   :  { %v569_v53 = vmax.f32 %v464_v47, 0.0  ;;  %v585_v54 = vmax.f32 %v504_v48, 0.0 }
  0xb5   :  { %v538_v55 = vmax.f32 %v386_v51, 0.0  ;;  %v554_v56 = vmax.f32 %v426_v52, 0.0 }
  0xb6   :  { %v633_v57 = vpack.c.bf16 %v569_v53, %v569_v53  ;;  %v649_v58 = vpack.c.bf16 %v585_v54, %v585_v54 }
  0xb7   :  { %v602_v59 = vpack.c.bf16 %v538_v55, %v538_v55  ;;  %v618_v60 = vpack.c.bf16 %v554_v56, %v554_v56 }
  0xb8   :  { %698 = vst.msk [vmem:[%s1432_s3 + $0x90] sm:$0xf] %vm661_vm1, %v633_v57 }
  0xb9   :  { %714 = vst.msk [vmem:[%s1432_s3 + $0xd0] sm:$0xf] %vm661_vm1, %v649_v58  ;;  %v465_v61 = vpop.f32.mrf.mxu2  ;;  %v505_v62 = vpop.f32.mrf.mxu3 }
  0xba   :  { %667 = vst.msk [vmem:[%s1432_s3 + $0x14] sm:$0xf] %vm661_vm1, %v602_v59  ;;  %v466_v63 = vadd.f32 %v1107_v35, %v465_v61  ;;  %v506_v0 = vadd.f32 %v1107_v35, %v505_v62  ;;  %v388_v1 = vpop.f32.mrf.mxu0  ;;  %v428_v2 = vpop.f32.mrf.mxu1 }
  0xbb   :  { %683 = vst.msk [vmem:[%s1432_s3 + $0x54] sm:$0xf] %vm661_vm1, %v618_v60  ;;  %v389_v3 = vadd.f32 %v1107_v35, %v388_v1  ;;  %v429_v4 = vadd.f32 %v1107_v35, %v428_v2 }
  0xbc   :  { %v570_v5 = vmax.f32 %v466_v63, 0.0  ;;  %v586_v6 = vmax.f32 %v506_v0, 0.0 }
  0xbd   :  { %v539_v7 = vmax.f32 %v389_v3, 0.0  ;;  %v555_v8 = vmax.f32 %v429_v4, 0.0 }
  0xbe   :  { %v634_v9 = vpack.c.bf16 %v570_v5, %v570_v5  ;;  %v650_v10 = vpack.c.bf16 %v586_v6, %v586_v6 }
  0xbf   :  { %v603_v11 = vpack.c.bf16 %v539_v7, %v539_v7  ;;  %v619_v12 = vpack.c.bf16 %v555_v8, %v555_v8 }
  0xc0   :  { %699 = vst.msk [vmem:[%s1432_s3 + $0x94] sm:$0xf] %vm661_vm1, %v634_v9 }
  0xc1   :  { %715 = vst.msk [vmem:[%s1432_s3 + $0xd4] sm:$0xf] %vm661_vm1, %v650_v10  ;;  %v468_v13 = vpop.f32.mrf.mxu2  ;;  %v508_v14 = vpop.f32.mrf.mxu3 }
  0xc2   :  { %668 = vst.msk [vmem:[%s1432_s3 + $0x18] sm:$0xf] %vm661_vm1, %v603_v11  ;;  %v469_v15 = vadd.f32 %v1107_v35, %v468_v13  ;;  %v509_v16 = vadd.f32 %v1107_v35, %v508_v14  ;;  %v390_v17 = vpop.f32.mrf.mxu0  ;;  %v430_v18 = vpop.f32.mrf.mxu1 }
  0xc3   :  { %684 = vst.msk [vmem:[%s1432_s3 + $0x58] sm:$0xf] %vm661_vm1, %v619_v12  ;;  %v391_v19 = vadd.f32 %v1107_v35, %v390_v17  ;;  %v431_v20 = vadd.f32 %v1107_v35, %v430_v18 }
  0xc4   :  { %v571_v21 = vmax.f32 %v469_v15, 0.0  ;;  %v587_v22 = vmax.f32 %v509_v16, 0.0 }
  0xc5   :  { %v540_v23 = vmax.f32 %v391_v19, 0.0  ;;  %v556_v24 = vmax.f32 %v431_v20, 0.0 }
  0xc6   :  { %v635_v25 = vpack.c.bf16 %v571_v21, %v571_v21  ;;  %v651_v26 = vpack.c.bf16 %v587_v22, %v587_v22 }
  0xc7   :  { %v604_v27 = vpack.c.bf16 %v540_v23, %v540_v23  ;;  %v620_v28 = vpack.c.bf16 %v556_v24, %v556_v24 }
  0xc8   :  { %700 = vst.msk [vmem:[%s1432_s3 + $0x98] sm:$0xf] %vm661_vm1, %v635_v25 }
  0xc9   :  { %716 = vst.msk [vmem:[%s1432_s3 + $0xd8] sm:$0xf] %vm661_vm1, %v651_v26  ;;  %v470_v29 = vpop.f32.mrf.mxu2  ;;  %v510_v30 = vpop.f32.mrf.mxu3 }
  0xca   :  { %669 = vst.msk [vmem:[%s1432_s3 + $0x1c] sm:$0xf] %vm661_vm1, %v604_v27  ;;  %v471_v31 = vadd.f32 %v1107_v35, %v470_v29  ;;  %v511_v32 = vadd.f32 %v1107_v35, %v510_v30  ;;  %v393_v33 = vpop.f32.mrf.mxu0  ;;  %v433_v34 = vpop.f32.mrf.mxu1 }
  0xcb   :  { %685 = vst.msk [vmem:[%s1432_s3 + $0x5c] sm:$0xf] %vm661_vm1, %v620_v28  ;;  %v394_v36 = vadd.f32 %v1107_v35, %v393_v33  ;;  %v434_v37 = vadd.f32 %v1107_v35, %v433_v34 }
  0xcc   :  { %v572_v38 = vmax.f32 %v471_v31, 0.0  ;;  %v588_v39 = vmax.f32 %v511_v32, 0.0 }
  0xcd   :  { %v541_v40 = vmax.f32 %v394_v36, 0.0  ;;  %v557_v41 = vmax.f32 %v434_v37, 0.0 }
  0xce   :  { %v636_v42 = vpack.c.bf16 %v572_v38, %v572_v38  ;;  %v652_v43 = vpack.c.bf16 %v588_v39, %v588_v39 }
  0xcf   :  { %v605_v44 = vpack.c.bf16 %v541_v40, %v541_v40  ;;  %v621_v45 = vpack.c.bf16 %v557_v41, %v557_v41 }
  0xd0   :  { %701 = vst.msk [vmem:[%s1432_s3 + $0x9c] sm:$0xf] %vm661_vm1, %v636_v42 }
  0xd1   :  { %717 = vst.msk [vmem:[%s1432_s3 + $0xdc] sm:$0xf] %vm661_vm1, %v652_v43  ;;  %v473_v46 = vpop.f32.mrf.mxu2  ;;  %v513_v47 = vpop.f32.mrf.mxu3 }
  0xd2   :  { %670 = vst.msk [vmem:[%s1432_s3 + $0x20] sm:$0xf] %vm661_vm1, %v605_v44  ;;  %v474_v48 = vadd.f32 %v1107_v35, %v473_v46  ;;  %v514_v49 = vadd.f32 %v1107_v35, %v513_v47  ;;  %v395_v50 = vpop.f32.mrf.mxu0  ;;  %v435_v51 = vpop.f32.mrf.mxu1 }
  0xd3   :  { %686 = vst.msk [vmem:[%s1432_s3 + $0x60] sm:$0xf] %vm661_vm1, %v621_v45  ;;  %v396_v52 = vadd.f32 %v1107_v35, %v395_v50  ;;  %v436_v53 = vadd.f32 %v1107_v35, %v435_v51 }
  0xd4   :  { %v573_v54 = vmax.f32 %v474_v48, 0.0  ;;  %v589_v55 = vmax.f32 %v514_v49, 0.0 }
  0xd5   :  { %v542_v56 = vmax.f32 %v396_v52, 0.0  ;;  %v558_v57 = vmax.f32 %v436_v53, 0.0 }
  0xd6   :  { %v637_v58 = vpack.c.bf16 %v573_v54, %v573_v54  ;;  %v653_v59 = vpack.c.bf16 %v589_v55, %v589_v55 }
  0xd7   :  { %v606_v60 = vpack.c.bf16 %v542_v56, %v542_v56  ;;  %v622_v61 = vpack.c.bf16 %v558_v57, %v558_v57 }
  0xd8   :  { %702 = vst.msk [vmem:[%s1432_s3 + $0xa0] sm:$0xf] %vm661_vm1, %v637_v58 }
  0xd9   :  { %718 = vst.msk [vmem:[%s1432_s3 + $0xe0] sm:$0xf] %vm661_vm1, %v653_v59  ;;  %v475_v62 = vpop.f32.mrf.mxu2  ;;  %v515_v63 = vpop.f32.mrf.mxu3 }
  0xda   :  { %671 = vst.msk [vmem:[%s1432_s3 + $0x24] sm:$0xf] %vm661_vm1, %v606_v60  ;;  %v476_v0 = vadd.f32 %v1107_v35, %v475_v62  ;;  %v516_v1 = vadd.f32 %v1107_v35, %v515_v63  ;;  %v398_v2 = vpop.f32.mrf.mxu0  ;;  %v438_v3 = vpop.f32.mrf.mxu1 }
  0xdb   :  { %687 = vst.msk [vmem:[%s1432_s3 + $0x64] sm:$0xf] %vm661_vm1, %v622_v61  ;;  %v399_v4 = vadd.f32 %v1107_v35, %v398_v2  ;;  %v439_v5 = vadd.f32 %v1107_v35, %v438_v3 }
  0xdc   :  { %v574_v6 = vmax.f32 %v476_v0, 0.0  ;;  %v590_v7 = vmax.f32 %v516_v1, 0.0 }
  0xdd   :  { %v543_v8 = vmax.f32 %v399_v4, 0.0  ;;  %v559_v9 = vmax.f32 %v439_v5, 0.0 }
  0xde   :  { %v638_v10 = vpack.c.bf16 %v574_v6, %v574_v6  ;;  %v654_v11 = vpack.c.bf16 %v590_v7, %v590_v7 }
  0xdf   :  { %v607_v12 = vpack.c.bf16 %v543_v8, %v543_v8  ;;  %v623_v13 = vpack.c.bf16 %v559_v9, %v559_v9 }
  0xe0   :  { %703 = vst.msk [vmem:[%s1432_s3 + $0xa4] sm:$0xf] %vm661_vm1, %v638_v10 }
  0xe1   :  { %719 = vst.msk [vmem:[%s1432_s3 + $0xe4] sm:$0xf] %vm661_vm1, %v654_v11  ;;  %v478_v14 = vpop.f32.mrf.mxu2  ;;  %v518_v15 = vpop.f32.mrf.mxu3 }
  0xe2   :  { %672 = vst.msk [vmem:[%s1432_s3 + $0x28] sm:$0xf] %vm661_vm1, %v607_v12  ;;  %v479_v16 = vadd.f32 %v1107_v35, %v478_v14  ;;  %v519_v17 = vadd.f32 %v1107_v35, %v518_v15  ;;  %v400_v18 = vpop.f32.mrf.mxu0  ;;  %v440_v19 = vpop.f32.mrf.mxu1 }
  0xe3   :  { %688 = vst.msk [vmem:[%s1432_s3 + $0x68] sm:$0xf] %vm661_vm1, %v623_v13  ;;  %v401_v20 = vadd.f32 %v1107_v35, %v400_v18  ;;  %v441_v21 = vadd.f32 %v1107_v35, %v440_v19 }
  0xe4   :  { %v575_v22 = vmax.f32 %v479_v16, 0.0  ;;  %v591_v23 = vmax.f32 %v519_v17, 0.0 }
  0xe5   :  { %v544_v24 = vmax.f32 %v401_v20, 0.0  ;;  %v560_v25 = vmax.f32 %v441_v21, 0.0 }
  0xe6   :  { %v639_v26 = vpack.c.bf16 %v575_v22, %v575_v22  ;;  %v655_v27 = vpack.c.bf16 %v591_v23, %v591_v23 }
  0xe7   :  { %v608_v28 = vpack.c.bf16 %v544_v24, %v544_v24  ;;  %v624_v29 = vpack.c.bf16 %v560_v25, %v560_v25 }
  0xe8   :  { %704 = vst.msk [vmem:[%s1432_s3 + $0xa8] sm:$0xf] %vm661_vm1, %v639_v26 }
  0xe9   :  { %720 = vst.msk [vmem:[%s1432_s3 + $0xe8] sm:$0xf] %vm661_vm1, %v655_v27  ;;  %v480_v30 = vpop.f32.mrf.mxu2  ;;  %v520_v31 = vpop.f32.mrf.mxu3 }
  0xea   :  { %673 = vst.msk [vmem:[%s1432_s3 + $0x2c] sm:$0xf] %vm661_vm1, %v608_v28  ;;  %v481_v32 = vadd.f32 %v1107_v35, %v480_v30  ;;  %v521_v33 = vadd.f32 %v1107_v35, %v520_v31  ;;  %v403_v34 = vpop.f32.mrf.mxu0  ;;  %v443_v36 = vpop.f32.mrf.mxu1 }
  0xeb   :  { %689 = vst.msk [vmem:[%s1432_s3 + $0x6c] sm:$0xf] %vm661_vm1, %v624_v29  ;;  %v404_v37 = vadd.f32 %v1107_v35, %v403_v34  ;;  %v444_v38 = vadd.f32 %v1107_v35, %v443_v36 }
  0xec   :  { %v576_v39 = vmax.f32 %v481_v32, 0.0  ;;  %v592_v40 = vmax.f32 %v521_v33, 0.0 }
  0xed   :  { %v545_v41 = vmax.f32 %v404_v37, 0.0  ;;  %v561_v42 = vmax.f32 %v444_v38, 0.0 }
  0xee   :  { %v640_v43 = vpack.c.bf16 %v576_v39, %v576_v39  ;;  %v656_v44 = vpack.c.bf16 %v592_v40, %v592_v40 }
  0xef   :  { %v609_v45 = vpack.c.bf16 %v545_v41, %v545_v41  ;;  %v625_v46 = vpack.c.bf16 %v561_v42, %v561_v42 }
  0xf0   :  { %705 = vst.msk [vmem:[%s1432_s3 + $0xac] sm:$0xf] %vm661_vm1, %v640_v43 }
  0xf1   :  { %721 = vst.msk [vmem:[%s1432_s3 + $0xec] sm:$0xf] %vm661_vm1, %v656_v44  ;;  %v483_v47 = vpop.f32.mrf.mxu2  ;;  %v523_v48 = vpop.f32.mrf.mxu3 }
  0xf2   :  { %674 = vst.msk [vmem:[%s1432_s3 + $0x30] sm:$0xf] %vm661_vm1, %v609_v45  ;;  %v484_v49 = vadd.f32 %v1107_v35, %v483_v47  ;;  %v524_v50 = vadd.f32 %v1107_v35, %v523_v48  ;;  %v405_v51 = vpop.f32.mrf.mxu0  ;;  %v445_v52 = vpop.f32.mrf.mxu1 }
  0xf3   :  { %690 = vst.msk [vmem:[%s1432_s3 + $0x70] sm:$0xf] %vm661_vm1, %v625_v46  ;;  %v406_v53 = vadd.f32 %v1107_v35, %v405_v51  ;;  %v446_v54 = vadd.f32 %v1107_v35, %v445_v52 }
  0xf4   :  { %v577_v55 = vmax.f32 %v484_v49, 0.0  ;;  %v593_v56 = vmax.f32 %v524_v50, 0.0 }
  0xf5   :  { %v546_v57 = vmax.f32 %v406_v53, 0.0  ;;  %v562_v58 = vmax.f32 %v446_v54, 0.0 }
  0xf6   :  { %v641_v59 = vpack.c.bf16 %v577_v55, %v577_v55  ;;  %v657_v60 = vpack.c.bf16 %v593_v56, %v593_v56 }
  0xf7   :  { %v610_v61 = vpack.c.bf16 %v546_v57, %v546_v57  ;;  %v626_v62 = vpack.c.bf16 %v562_v58, %v562_v58 }
  0xf8   :  { %706 = vst.msk [vmem:[%s1432_s3 + $0xb0] sm:$0xf] %vm661_vm1, %v641_v59 }
  0xf9   :  { %722 = vst.msk [vmem:[%s1432_s3 + $0xf0] sm:$0xf] %vm661_vm1, %v657_v60  ;;  %v485_v63 = vpop.f32.mrf.mxu2  ;;  %v525_v0 = vpop.f32.mrf.mxu3 }
  0xfa   :  { %675 = vst.msk [vmem:[%s1432_s3 + $0x34] sm:$0xf] %vm661_vm1, %v610_v61  ;;  %v486_v1 = vadd.f32 %v1107_v35, %v485_v63  ;;  %v526_v2 = vadd.f32 %v1107_v35, %v525_v0  ;;  %v408_v3 = vpop.f32.mrf.mxu0  ;;  %v448_v4 = vpop.f32.mrf.mxu1 }
  0xfb   :  { %691 = vst.msk [vmem:[%s1432_s3 + $0x74] sm:$0xf] %vm661_vm1, %v626_v62  ;;  %v409_v5 = vadd.f32 %v1107_v35, %v408_v3  ;;  %v449_v6 = vadd.f32 %v1107_v35, %v448_v4 }
  0xfc   :  { %v578_v7 = vmax.f32 %v486_v1, 0.0  ;;  %v594_v8 = vmax.f32 %v526_v2, 0.0 }
  0xfd   :  { %v547_v9 = vmax.f32 %v409_v5, 0.0  ;;  %v563_v10 = vmax.f32 %v449_v6, 0.0 }
  0xfe   :  { %v642_v11 = vpack.c.bf16 %v578_v7, %v578_v7  ;;  %v658_v12 = vpack.c.bf16 %v594_v8, %v594_v8 }
  0xff   :  { %v611_v13 = vpack.c.bf16 %v547_v9, %v547_v9  ;;  %v627_v14 = vpack.c.bf16 %v563_v10, %v563_v10 }
 0x100   :  { %707 = vst.msk [vmem:[%s1432_s3 + $0xb4] sm:$0xf] %vm661_vm1, %v642_v11 }
 0x101   :  { %723 = vst.msk [vmem:[%s1432_s3 + $0xf4] sm:$0xf] %vm661_vm1, %v658_v12  ;;  %v488_v15 = vpop.f32.mrf.mxu2  ;;  %v528_v16 = vpop.f32.mrf.mxu3 }
 0x102   :  { %676 = vst.msk [vmem:[%s1432_s3 + $0x38] sm:$0xf] %vm661_vm1, %v611_v13  ;;  %v489_v17 = vadd.f32 %v1107_v35, %v488_v15  ;;  %v529_v18 = vadd.f32 %v1107_v35, %v528_v16  ;;  %v410_v19 = vpop.f32.mrf.mxu0  ;;  %v450_v20 = vpop.f32.mrf.mxu1 }
 0x103   :  { %692 = vst.msk [vmem:[%s1432_s3 + $0x78] sm:$0xf] %vm661_vm1, %v627_v14  ;;  %v411_v21 = vadd.f32 %v1107_v35, %v410_v19  ;;  %v451_v22 = vadd.f32 %v1107_v35, %v450_v20 }
 0x104   :  { %v579_v23 = vmax.f32 %v489_v17, 0.0  ;;  %v595_v24 = vmax.f32 %v529_v18, 0.0 }
 0x105   :  { %v548_v25 = vmax.f32 %v411_v21, 0.0  ;;  %v564_v26 = vmax.f32 %v451_v22, 0.0 }
 0x106   :  { %v643_v27 = vpack.c.bf16 %v579_v23, %v579_v23  ;;  %v659_v28 = vpack.c.bf16 %v595_v24, %v595_v24 }
 0x107   :  { %v612_v29 = vpack.c.bf16 %v548_v25, %v548_v25  ;;  %v628_v30 = vpack.c.bf16 %v564_v26, %v564_v26 }
 0x108   :  { %708 = vst.msk [vmem:[%s1432_s3 + $0xb8] sm:$0xf] %vm661_vm1, %v643_v27 }
 0x109   :  { %724 = vst.msk [vmem:[%s1432_s3 + $0xf8] sm:$0xf] %vm661_vm1, %v659_v28  ;;  %v490_v31 = vpop.f32.mrf.mxu2  ;;  %v530_v32 = vpop.f32.mrf.mxu3 }
 0x10a   :  { %677 = vst.msk [vmem:[%s1432_s3 + $0x3c] sm:$0xf] %vm661_vm1, %v612_v29  ;;  %v491_v33 = vadd.f32 %v1107_v35, %v490_v31  ;;  %v531_v34 = vadd.f32 %v1107_v35, %v530_v32 }
 0x10b   :  { %693 = vst.msk [vmem:[%s1432_s3 + $0x7c] sm:$0xf] %vm661_vm1, %v628_v30 }
 0x10c   :  { %v580_v36 = vmax.f32 %v491_v33, 0.0  ;;  %v596_v37 = vmax.f32 %v531_v34, 0.0 }
 0x10e   :  { %v644_v38 = vpack.c.bf16 %v580_v36, %v580_v36  ;;  %v660_v39 = vpack.c.bf16 %v596_v37, %v596_v37 }
 0x110   :  { %709 = vst.msk [vmem:[%s1432_s3 + $0xbc] sm:$0xf] %vm661_vm1, %v644_v38 }
 0x111   :  { %725 = vst.msk [vmem:[%s1432_s3 + $0xfc] sm:$0xf] %vm661_vm1, %v660_v39 }

</bundles_post_ra>
